<compile_context>
chip_gen: v7x
topology: tpu7x:2x2x1
jax: 0.10.0
libtpu: 0.0.40
codegen_flags: <defaults>
</compile_context>

<pallas_src>
import jax
import jax.numpy as jnp
from jax.experimental import pallas as pl
from jax.experimental.pallas import tpu as pltpu

_LANE = 128       # vreg lane width
_SUBLANE = 8      # vreg sublane count (f32)
_BLOCK_ROWS = 1024  # row tile: 1024*128*4B = 512 KiB per f32 buffer


def _affine_kernel(x_ref, o_ref):
    x = x_ref[...]
    if x.dtype == jnp.bfloat16:
        # Native bf16 VALU path on v6e/v7x (Mosaic handles v5e lowering).
        y = x * jnp.bfloat16(0.75) + jnp.bfloat16(0.75)
    else:
        # ((x + 2) - 1) * 3 / 4  ==  x * 0.75 + 0.75   (2 VPU ops, no divide)
        y = x.astype(jnp.float32) * jnp.float32(0.75) + jnp.float32(0.75)
    o_ref[...] = y.astype(o_ref.dtype)


def _pt_module_forward_impl(x):
    orig_shape = x.shape
    orig_dtype = x.dtype
    total = x.size
    itemsize = jnp.dtype(orig_dtype).itemsize

    # ---- present a lane/sublane-dense (rows, 128) slab to the kernel ----
    rows = pl.cdiv(total, _LANE)
    rows = ((rows + _SUBLANE - 1) // _SUBLANE) * _SUBLANE     # sublane-dense
    if rows > _BLOCK_ROWS:
        # Pad rows to a multiple of the row tile so the grid divides evenly.
        rows = ((rows + _BLOCK_ROWS - 1) // _BLOCK_ROWS) * _BLOCK_ROWS
        tile_rows = _BLOCK_ROWS
    else:
        tile_rows = rows

    padded = rows * _LANE
    flat = x.reshape(-1)
    if padded != total:
        flat = jnp.pad(flat, (0, padded - total))
    x2 = flat.reshape(rows, _LANE)

    grid = (rows // tile_rows,)
    tile_bytes = tile_rows * _LANE * itemsize
    # in + out, double-buffered = 4 * tile_bytes; give 2x headroom, >= 4 MiB.
    vmem_limit = min(max(8 * tile_bytes, 4 * 1024 * 1024), 64 * 1024 * 1024)

    out2 = pl.pallas_call(
        _affine_kernel,
        out_shape=jax.ShapeDtypeStruct((rows, _LANE), orig_dtype),
        grid=grid,
        in_specs=[pl.BlockSpec((tile_rows, _LANE), lambda i: (i, 0))],
        out_specs=pl.BlockSpec((tile_rows, _LANE), lambda i: (i, 0)),
        input_output_aliases={0: 0},   # elementwise: reuse input HBM buffer
        compiler_params=pltpu.CompilerParams(
            dimension_semantics=("parallel",),   # v7x: shard grid over 2 TCs
            vmem_limit_bytes=vmem_limit,
        ),
    )(x2)

    if padded != total:
        return out2.reshape(-1)[:total].reshape(orig_shape)
    return out2.reshape(orig_shape)


# jit so the pad/reshape/slice plumbing fuses with neighbors around the kernel.
pt_module_forward = jax.jit(_pt_module_forward_impl)


if __name__ == "__main__":
    key = jax.random.PRNGKey(0)
    x = jax.random.normal(key, (2, 4, 16, 16), dtype=jnp.float32)

    out = pt_module_forward(x)
    out = jax.block_until_ready(out)

    # Reference check against the original (unfolded) op chain.
    ref = ((x + 2.0) - 1.0) * 3.0 / 4.0
    assert out.shape == x.shape and out.dtype == x.dtype
    assert jnp.allclose(out, ref, atol=1e-5, rtol=1e-5)

    # Also exercise a non-multiple-of-128 size to cover the padding path.
    x_odd = jax.random.normal(jax.random.PRNGKey(1), (3, 5, 7), dtype=jnp.float32)
    out_odd = jax.block_until_ready(pt_module_forward(x_odd))
    ref_odd = ((x_odd + 2.0) - 1.0) * 3.0 / 4.0
    assert out_odd.shape == x_odd.shape
    assert jnp.allclose(out_odd, ref_odd, atol=1e-5, rtol=1e-5)

    print("KERNEL_OK")
</pallas_src>

<mosaic_0001>
module attributes {stable_mosaic.version = 11 : i64} {
  func.func @_affine_kernel(%arg0: i32, %arg1: memref<16x128xf32, #tpu.memory_space<vmem>>, %arg2: memref<16x128xf32, #tpu.memory_space<vmem>>) attributes {dimension_semantics = [#tpu.dimension_semantics<parallel>], iteration_bounds = array<i64: 1>, scalar_prefetch = 0 : i64, scratch_operands = 0 : i64, tpu.core_type = #tpu.core_type<tc>, window_params = [{transform_indices = @transform_0, window_bounds = array<i64: 16, 128>}, {transform_indices = @transform_1, window_bounds = array<i64: 16, 128>}]} {
    %c0 = arith.constant 0 : index
    %c0_0 = arith.constant 0 : index
    %0 = vector.load %arg1[%c0, %c0_0] : memref<16x128xf32, #tpu.memory_space<vmem>>, vector<16x128xf32>
    %cst = arith.constant 7.500000e-01 : f32
    %1 = vector.broadcast %cst : f32 to vector<16x128xf32>
    %2 = arith.mulf %0, %1 : vector<16x128xf32>
    %cst_1 = arith.constant 7.500000e-01 : f32
    %3 = vector.broadcast %cst_1 : f32 to vector<16x128xf32>
    %4 = arith.addf %2, %3 : vector<16x128xf32>
    %c0_2 = arith.constant 0 : index
    %c0_3 = arith.constant 0 : index
    %5 = vector.load %arg2[%c0_2, %c0_3] : memref<16x128xf32, #tpu.memory_space<vmem>>, vector<16x128xf32>
    tpu.vector_store %arg2[%c0_2, %c0_3], %4 {strides = array<i32>} : memref<16x128xf32, #tpu.memory_space<vmem>>, vector<16x128xf32>,
    return
  }
  func.func @transform_0(%arg0: i32) -> (i32, i32) {
    %c0_i32 = arith.constant 0 : i32
    %c0_i32_0 = arith.constant 0 : i32
    return %arg0, %c0_i32 : i32, i32
  }
  func.func @transform_1(%arg0: i32) -> (i32, i32) {
    %c0_i32 = arith.constant 0 : i32
    %c0_i32_0 = arith.constant 0 : i32
    return %arg0, %c0_i32 : i32, i32
  }
}

</mosaic_0001>

<bundles_post_ra>
// kernel: _pt_module_forward_impl.1
= control target key start
LH: loop header
LB: loop body
LE: loop exit
PB: predicated region body
PF: predicated region fallthrough
CT: control target
= control target key end

     0   :  { %s42_s0 = inlined_call_operand.vmem [shape: f32[16,128], index: 0, kind: input, shape index: {}, may-alias: {0,1}]   ;;  %s43_s1 = inlined_call_operand.vmem [shape: f32[16,128], index: 1, kind: output, shape index: {}, may-alias: {0,1}]  }
   0x1   :  { %v8_v0 = vld [vmem:[%s42_s0] sm:$0xff]  ;;  %v9_v1 = vld [vmem:[%s42_s0 + $0x8] sm:$0xff] }
   0x2   :  { %v10_v2 = vmul.f32 0.75, %v8_v0  ;;  %v11_v3 = vmul.f32 0.75, %v9_v1 }
   0x4   :  { %v12_v4 = vadd.f32 0.75, %v10_v2  ;;  %v13_v5 = vadd.f32 0.75, %v11_v3 }
   0x6   :  { %14 = vst [vmem:[%s43_s1] sm:$0xff] %v12_v4  ;;  %15 = vst [vmem:[%s43_s1 + $0x8] sm:$0xff] %v13_v5 }

</bundles_post_ra>
